<compile_context>
chip_gen: v7x
topology: tpu7x:2x2x1
jax: 0.10.0
libtpu: 0.0.40
codegen_flags: <defaults>
</compile_context>

<pallas_src>
import functools

import jax
import jax.numpy as jnp
from jax.experimental import pallas as pl
from jax.experimental.pallas import tpu as pltpu


LANE = 128      # lane width; also the padded hidden/output width
TILE_GRAN = 32  # batch-tile granularity (covers f32 (8,128), bf16 (16,128), i8 (32,128) tiling)


def _round_up(n: int, m: int) -> int:
    return ((n + m - 1) // m) * m


def dqn_kernel(x_ref,
               w1_ref, b1_ref,
               w2_ref, b2_ref,
               w3_ref, b3_ref,
               w4_ref, b4_ref,
               o_ref):
    """Fused forward pass for one batch tile.

    x_ref:  (TILE_B, state_dim)  native dtype (cast to bf16 in-kernel)
    wN_ref: (in, out_padded)     bf16, resident in VMEM across grid steps
    bN_ref: (1, out_padded)      f32
    o_ref:  (TILE_B, LANE)       bf16 (lane-dense; wrapper slices action_dim)
    """
    cd = w1_ref.dtype
    x = x_ref[...].astype(cd)   # free VPU cast under the DMA/MXU

    # fc1 + ReLU  (bf16 MXU operands, f32 accumulate + elementwise)
    h = jnp.dot(x, w1_ref[...], preferred_element_type=jnp.float32) + b1_ref[...]
    h = jnp.maximum(h, 0.0).astype(cd)

    # fc2 + ReLU
    h = jnp.dot(h, w2_ref[...], preferred_element_type=jnp.float32) + b2_ref[...]
    h = jnp.maximum(h, 0.0).astype(cd)

    # fc3 + ReLU (hidden padded 64 -> 128; padded lanes are exactly 0)
    h = jnp.dot(h, w3_ref[...], preferred_element_type=jnp.float32) + b3_ref[...]
    h = jnp.maximum(h, 0.0).astype(cd)

    # fc4 (no activation — raw Q-values), output padded to LANE lanes
    q = jnp.dot(h, w4_ref[...], preferred_element_type=jnp.float32) + b4_ref[...]
    o_ref[...] = q.astype(o_ref.dtype)


def init_params(key, state_dim, action_dim):
    """Logical (unpadded) f32 params. Weights stored (in, out) = PyTorch W.T."""
    dims = [(state_dim, 128), (128, 128), (128, 64), (64, action_dim)]
    params = {}
    for i, (fan_in, fan_out) in enumerate(dims, start=1):
        key, wk, bk = jax.random.split(key, 3)
        bound = 1.0 / jnp.sqrt(jnp.float32(fan_in))
        params[f"w{i}"] = jax.random.uniform(
            wk, (fan_in, fan_out), dtype=jnp.float32, minval=-bound, maxval=bound)
        params[f"b{i}"] = jax.random.uniform(
            bk, (1, fan_out), dtype=jnp.float32, minval=-bound, maxval=bound)
    return params


def prepare_params(params, compute_dtype=jnp.bfloat16):
    """Pad the narrow dims (h3=64, action_dim) to LANE lanes and cast weights
    to the MXU compute dtype.  Biases stay f32 (f32 VPU path on all chips)."""
    def pad2(a, rows, cols):
        return jnp.pad(a, ((0, rows - a.shape[0]), (0, cols - a.shape[1])))

    state_dim = params["w1"].shape[0]
    p = {
        "w1": params["w1"].astype(compute_dtype),                     # (S, 128)
        "b1": params["b1"],                                           # (1, 128)
        "w2": params["w2"].astype(compute_dtype),                     # (128, 128)
        "b2": params["b2"],                                           # (1, 128)
        "w3": pad2(params["w3"], 128, LANE).astype(compute_dtype),    # (128, 128)
        "b3": pad2(params["b3"], 1, LANE),                            # (1, 128)
        "w4": pad2(params["w4"], LANE, LANE).astype(compute_dtype),   # (128, 128)
        "b4": pad2(params["b4"], 1, LANE),                            # (1, 128)
    }
    return p, state_dim


@functools.partial(jax.jit,
                   static_argnames=("action_dim", "tile_b", "single_buffer_weights"))
def dqn_forward(x, padded_params, *, action_dim, tile_b=4096,
                single_buffer_weights=True):
    """Forward pass via the fused Pallas kernel.

    x:             (batch, state_dim) — streamed in native dtype.
    padded_params: output of prepare_params.
    returns:       (batch, action_dim) f32 Q-values (bf16 writeback precision).
    """
    batch, state_dim = x.shape
    out_dtype = padded_params["w1"].dtype   # bf16 lane-dense writeback

    # Tile: big enough to amortize per-step overhead (default 4096), small
    # enough to give >=2 grid steps for megacore sharding on v7x, multiple of
    # 32 sublanes.  No batch padding: Pallas masks the trailing partial block.
    tile = min(int(tile_b), _round_up(pl.cdiv(batch, 2), TILE_GRAN))
    tile = _round_up(max(tile, TILE_GRAN), TILE_GRAN)
    grid = (pl.cdiv(batch, tile),)

    # Weights/biases: constant index_map -> fetched once, resident in VMEM.
    # Buffered(1): constants don't need double buffering (saves ~130 KB VMEM).
    def const_spec(arr):
        if single_buffer_weights and hasattr(pl, "Buffered"):
            return pl.BlockSpec(arr.shape, lambda i: (0, 0),
                                pipeline_mode=pl.Buffered(1))
        return pl.BlockSpec(arr.shape, lambda i: (0, 0))

    out_padded = pl.pallas_call(
        dqn_kernel,
        out_shape=jax.ShapeDtypeStruct((batch, LANE), out_dtype),
        grid=grid,
        in_specs=[
            pl.BlockSpec((tile, state_dim), lambda i: (i, 0)),   # x tile (streamed)
            const_spec(padded_params["w1"]), const_spec(padded_params["b1"]),
            const_spec(padded_params["w2"]), const_spec(padded_params["b2"]),
            const_spec(padded_params["w3"]), const_spec(padded_params["b3"]),
            const_spec(padded_params["w4"]), const_spec(padded_params["b4"]),
        ],
        out_specs=pl.BlockSpec((tile, LANE), lambda i: (i, 0)),  # lane-dense store
        compiler_params=pltpu.CompilerParams(
            dimension_semantics=("parallel",),
            vmem_limit_bytes=48 * 1024 * 1024),
    )(
        x,
        padded_params["w1"], padded_params["b1"],
        padded_params["w2"], padded_params["b2"],
        padded_params["w3"], padded_params["b3"],
        padded_params["w4"], padded_params["b4"],
    )

    # Slice the real action_dim lanes back out; callers get f32.
    return out_padded[:, :action_dim].astype(jnp.float32)


def run_forward(x, padded_params, action_dim):
    """Call the kernel; if this jax build rejects BlockSpec(pipeline_mode=...),
    fall back to default double-buffered weight specs."""
    try:
        return dqn_forward(x, padded_params, action_dim=action_dim)
    except Exception:
        return dqn_forward(x, padded_params, action_dim=action_dim,
                           single_buffer_weights=False)


def ref_forward(x, params, compute_dtype=jnp.bfloat16):
    """Pure-JAX reference mimicking the kernel's bf16-operand / f32-accumulate
    numerics (matches PyTorch DQNNetwork.forward semantics)."""
    cd = compute_dtype
    h = x.astype(cd)
    h = jnp.maximum(
        jnp.dot(h, params["w1"].astype(cd), preferred_element_type=jnp.float32)
        + params["b1"], 0.0).astype(cd)
    h = jnp.maximum(
        jnp.dot(h, params["w2"].astype(cd), preferred_element_type=jnp.float32)
        + params["b2"], 0.0).astype(cd)
    h = jnp.maximum(
        jnp.dot(h, params["w3"].astype(cd), preferred_element_type=jnp.float32)
        + params["b3"], 0.0).astype(cd)
    return (jnp.dot(h, params["w4"].astype(cd), preferred_element_type=jnp.float32)
            + params["b4"])


if __name__ == "__main__":
    batch = 2
    state_dim = 16
    action_dim = 4

    key = jax.random.PRNGKey(0)
    key, xk = jax.random.split(key)
    x = jax.random.normal(xk, (batch, state_dim), dtype=jnp.float32)

    params = init_params(key, state_dim, action_dim)
    padded_params, _ = prepare_params(params, compute_dtype=jnp.bfloat16)

    # Pallas fused forward (small batch, single grid step)
    q = jax.block_until_ready(run_forward(x, padded_params, action_dim))
    q_ref = ref_forward(x, params)
    assert q.shape == (batch, action_dim), q.shape
    # bf16 writeback precision: ~2^-9 relative, so use a 2e-2 tolerance.
    assert jnp.allclose(q, q_ref, atol=2e-2, rtol=2e-2), "mismatch vs reference"

    # Larger, non-multiple batch: exercises the 2-step grid and the masked
    # partial trailing block (no wrapper-side padding).
    key, xk2 = jax.random.split(key)
    xb = jax.random.normal(xk2, (1030, state_dim), dtype=jnp.float32)
    qb = jax.block_until_ready(run_forward(xb, padded_params, action_dim))
    qb_ref = ref_forward(xb, params)
    assert qb.shape == (1030, action_dim)
    assert jnp.allclose(qb, qb_ref, atol=2e-2, rtol=2e-2), "mismatch (big batch)"

    print("KERNEL_OK")
</pallas_src>

<mosaic_0001>
module attributes {stable_mosaic.version = 11 : i64} {
  func.func @dqn_kernel(%arg0: i32, %arg1: memref<32x16xf32, #tpu.memory_space<vmem>>, %arg2: memref<16x128xbf16, #tpu.memory_space<vmem>>, %arg3: memref<1x128xf32, #tpu.memory_space<vmem>>, %arg4: memref<128x128xbf16, #tpu.memory_space<vmem>>, %arg5: memref<1x128xf32, #tpu.memory_space<vmem>>, %arg6: memref<128x128xbf16, #tpu.memory_space<vmem>>, %arg7: memref<1x128xf32, #tpu.memory_space<vmem>>, %arg8: memref<128x128xbf16, #tpu.memory_space<vmem>>, %arg9: memref<1x128xf32, #tpu.memory_space<vmem>>, %arg10: memref<32x128xbf16, #tpu.memory_space<vmem>>) attributes {dimension_semantics = [#tpu.dimension_semantics<parallel>], iteration_bounds = array<i64: 1>, scalar_prefetch = 0 : i64, scratch_operands = 0 : i64, tpu.core_type = #tpu.core_type<tc>, window_params = [{transform_indices = @transform_0, window_bounds = array<i64: 32, 16>}, {pipeline_mode = #tpu.pipeline_mode<synchronous>, transform_indices = @transform_1, window_bounds = array<i64: 16, 128>}, {pipeline_mode = #tpu.pipeline_mode<synchronous>, transform_indices = @transform_2, window_bounds = array<i64: 1, 128>}, {pipeline_mode = #tpu.pipeline_mode<synchronous>, transform_indices = @transform_3, window_bounds = array<i64: 128, 128>}, {pipeline_mode = #tpu.pipeline_mode<synchronous>, transform_indices = @transform_4, window_bounds = array<i64: 1, 128>}, {pipeline_mode = #tpu.pipeline_mode<synchronous>, transform_indices = @transform_5, window_bounds = array<i64: 128, 128>}, {pipeline_mode = #tpu.pipeline_mode<synchronous>, transform_indices = @transform_6, window_bounds = array<i64: 1, 128>}, {pipeline_mode = #tpu.pipeline_mode<synchronous>, transform_indices = @transform_7, window_bounds = array<i64: 128, 128>}, {pipeline_mode = #tpu.pipeline_mode<synchronous>, transform_indices = @transform_8, window_bounds = array<i64: 1, 128>}, {transform_indices = @transform_9, window_bounds = array<i64: 32, 128>}]} {
    %c0 = arith.constant 0 : index
    %c0_0 = arith.constant 0 : index
    %0 = vector.load %arg1[%c0, %c0_0] : memref<32x16xf32, #tpu.memory_space<vmem>>, vector<32x16xf32>
    %1 = arith.truncf %0 : vector<32x16xf32> to vector<32x16xbf16>
    %c0_1 = arith.constant 0 : index
    %c0_2 = arith.constant 0 : index
    %2 = vector.load %arg2[%c0_1, %c0_2] : memref<16x128xbf16, #tpu.memory_space<vmem>>, vector<16x128xbf16>
    %cst = arith.constant dense<0.000000e+00> : vector<32x128xf32>
    %3 = tpu.matmul %1, %2, %cst {dimension_numbers = #tpu.dot_dimension_numbers<[1], [0], [0], [1], [0, 0, 1, 1], [], []>} : vector<32x16xbf16>, vector<16x128xbf16>, vector<32x128xf32> -> vector<32x128xf32>
    %c0_3 = arith.constant 0 : index
    %c0_4 = arith.constant 0 : index
    %4 = vector.load %arg3[%c0_3, %c0_4] : memref<1x128xf32, #tpu.memory_space<vmem>>, vector<1x128xf32>
    %5 = vector.broadcast %4 : vector<1x128xf32> to vector<32x128xf32>
    %6 = arith.addf %3, %5 : vector<32x128xf32>
    %cst_5 = arith.constant 0.000000e+00 : f32
    %7 = vector.broadcast %cst_5 : f32 to vector<32x128xf32>
    %8 = arith.maximumf %6, %7 : vector<32x128xf32>
    %9 = arith.truncf %8 : vector<32x128xf32> to vector<32x128xbf16>
    %c0_6 = arith.constant 0 : index
    %c0_7 = arith.constant 0 : index
    %10 = vector.load %arg4[%c0_6, %c0_7] : memref<128x128xbf16, #tpu.memory_space<vmem>>, vector<128x128xbf16>
    %cst_8 = arith.constant dense<0.000000e+00> : vector<32x128xf32>
    %11 = tpu.matmul %9, %10, %cst_8 {dimension_numbers = #tpu.dot_dimension_numbers<[1], [0], [0], [1], [0, 0, 1, 1], [], []>} : vector<32x128xbf16>, vector<128x128xbf16>, vector<32x128xf32> -> vector<32x128xf32>
    %c0_9 = arith.constant 0 : index
    %c0_10 = arith.constant 0 : index
    %12 = vector.load %arg5[%c0_9, %c0_10] : memref<1x128xf32, #tpu.memory_space<vmem>>, vector<1x128xf32>
    %13 = vector.broadcast %12 : vector<1x128xf32> to vector<32x128xf32>
    %14 = arith.addf %11, %13 : vector<32x128xf32>
    %cst_11 = arith.constant 0.000000e+00 : f32
    %15 = vector.broadcast %cst_11 : f32 to vector<32x128xf32>
    %16 = arith.maximumf %14, %15 : vector<32x128xf32>
    %17 = arith.truncf %16 : vector<32x128xf32> to vector<32x128xbf16>
    %c0_12 = arith.constant 0 : index
    %c0_13 = arith.constant 0 : index
    %18 = vector.load %arg6[%c0_12, %c0_13] : memref<128x128xbf16, #tpu.memory_space<vmem>>, vector<128x128xbf16>
    %cst_14 = arith.constant dense<0.000000e+00> : vector<32x128xf32>
    %19 = tpu.matmul %17, %18, %cst_14 {dimension_numbers = #tpu.dot_dimension_numbers<[1], [0], [0], [1], [0, 0, 1, 1], [], []>} : vector<32x128xbf16>, vector<128x128xbf16>, vector<32x128xf32> -> vector<32x128xf32>
    %c0_15 = arith.constant 0 : index
    %c0_16 = arith.constant 0 : index
    %20 = vector.load %arg7[%c0_15, %c0_16] : memref<1x128xf32, #tpu.memory_space<vmem>>, vector<1x128xf32>
    %21 = vector.broadcast %20 : vector<1x128xf32> to vector<32x128xf32>
    %22 = arith.addf %19, %21 : vector<32x128xf32>
    %cst_17 = arith.constant 0.000000e+00 : f32
    %23 = vector.broadcast %cst_17 : f32 to vector<32x128xf32>
    %24 = arith.maximumf %22, %23 : vector<32x128xf32>
    %25 = arith.truncf %24 : vector<32x128xf32> to vector<32x128xbf16>
    %c0_18 = arith.constant 0 : index
    %c0_19 = arith.constant 0 : index
    %26 = vector.load %arg8[%c0_18, %c0_19] : memref<128x128xbf16, #tpu.memory_space<vmem>>, vector<128x128xbf16>
    %cst_20 = arith.constant dense<0.000000e+00> : vector<32x128xf32>
    %27 = tpu.matmul %25, %26, %cst_20 {dimension_numbers = #tpu.dot_dimension_numbers<[1], [0], [0], [1], [0, 0, 1, 1], [], []>} : vector<32x128xbf16>, vector<128x128xbf16>, vector<32x128xf32> -> vector<32x128xf32>
    %c0_21 = arith.constant 0 : index
    %c0_22 = arith.constant 0 : index
    %28 = vector.load %arg9[%c0_21, %c0_22] : memref<1x128xf32, #tpu.memory_space<vmem>>, vector<1x128xf32>
    %29 = vector.broadcast %28 : vector<1x128xf32> to vector<32x128xf32>
    %30 = arith.addf %27, %29 : vector<32x128xf32>
    %31 = arith.truncf %30 : vector<32x128xf32> to vector<32x128xbf16>
    %c0_23 = arith.constant 0 : index
    %c0_24 = arith.constant 0 : index
    %32 = vector.load %arg10[%c0_23, %c0_24] : memref<32x128xbf16, #tpu.memory_space<vmem>>, vector<32x128xbf16>
    tpu.vector_store %arg10[%c0_23, %c0_24], %31 {strides = array<i32>} : memref<32x128xbf16, #tpu.memory_space<vmem>>, vector<32x128xbf16>,
    return
  }
  func.func @transform_0(%arg0: i32) -> (i32, i32) {
    %c0_i32 = arith.constant 0 : i32
    %c0_i32_0 = arith.constant 0 : i32
    return %arg0, %c0_i32 : i32, i32
  }
  func.func @transform_1(%arg0: i32) -> (i32, i32) {
    %c0_i32 = arith.constant 0 : i32
    %c0_i32_0 = arith.constant 0 : i32
    %c0_i32_1 = arith.constant 0 : i32
    return %c0_i32, %c0_i32_0 : i32, i32
  }
  func.func @transform_2(%arg0: i32) -> (i32, i32) {
    %c0_i32 = arith.constant 0 : i32
    %c0_i32_0 = arith.constant 0 : i32
    %c0_i32_1 = arith.constant 0 : i32
    return %c0_i32, %c0_i32_0 : i32, i32
  }
  func.func @transform_3(%arg0: i32) -> (i32, i32) {
    %c0_i32 = arith.constant 0 : i32
    %c0_i32_0 = arith.constant 0 : i32
    %c0_i32_1 = arith.constant 0 : i32
    return %c0_i32, %c0_i32_0 : i32, i32
  }
  func.func @transform_4(%arg0: i32) -> (i32, i32) {
    %c0_i32 = arith.constant 0 : i32
    %c0_i32_0 = arith.constant 0 : i32
    %c0_i32_1 = arith.constant 0 : i32
    return %c0_i32, %c0_i32_0 : i32, i32
  }
  func.func @transform_5(%arg0: i32) -> (i32, i32) {
    %c0_i32 = arith.constant 0 : i32
    %c0_i32_0 = arith.constant 0 : i32
    %c0_i32_1 = arith.constant 0 : i32
    return %c0_i32, %c0_i32_0 : i32, i32
  }
  func.func @transform_6(%arg0: i32) -> (i32, i32) {
    %c0_i32 = arith.constant 0 : i32
    %c0_i32_0 = arith.constant 0 : i32
    %c0_i32_1 = arith.constant 0 : i32
    return %c0_i32, %c0_i32_0 : i32, i32
  }
  func.func @transform_7(%arg0: i32) -> (i32, i32) {
    %c0_i32 = arith.constant 0 : i32
    %c0_i32_0 = arith.constant 0 : i32
    %c0_i32_1 = arith.constant 0 : i32
    return %c0_i32, %c0_i32_0 : i32, i32
  }
  func.func @transform_8(%arg0: i32) -> (i32, i32) {
    %c0_i32 = arith.constant 0 : i32
    %c0_i32_0 = arith.constant 0 : i32
    %c0_i32_1 = arith.constant 0 : i32
    return %c0_i32, %c0_i32_0 : i32, i32
  }
  func.func @transform_9(%arg0: i32) -> (i32, i32) {
    %c0_i32 = arith.constant 0 : i32
    %c0_i32_0 = arith.constant 0 : i32
    return %arg0, %c0_i32 : i32, i32
  }
}

module attributes {stable_mosaic.version = 11 : i64} {
  func.func @dqn_kernel(%arg0: i32, %arg1: memref<32x16xf32, #tpu.memory_space<vmem>>, %arg2: memref<16x128xbf16, #tpu.memory_space<vmem>>, %arg3: memref<1x128xf32, #tpu.memory_space<vmem>>, %arg4: memref<128x128xbf16, #tpu.memory_space<vmem>>, %arg5: memref<1x128xf32, #tpu.memory_space<vmem>>, %arg6: memref<128x128xbf16, #tpu.memory_space<vmem>>, %arg7: memref<1x128xf32, #tpu.memory_space<vmem>>, %arg8: memref<128x128xbf16, #tpu.memory_space<vmem>>, %arg9: memref<1x128xf32, #tpu.memory_space<vmem>>, %arg10: memref<32x128xbf16, #tpu.memory_space<vmem>>) attributes {dimension_semantics = [#tpu.dimension_semantics<parallel>], iteration_bounds = array<i64: 1>, scalar_prefetch = 0 : i64, scratch_operands = 0 : i64, tpu.core_type = #tpu.core_type<tc>, window_params = [{transform_indices = @transform_0, window_bounds = array<i64: 32, 16>}, {pipeline_mode = #tpu.pipeline_mode<synchronous>, transform_indices = @transform_1, window_bounds = array<i64: 16, 128>}, {pipeline_mode = #tpu.pipeline_mode<synchronous>, transform_indices = @transform_2, window_bounds = array<i64: 1, 128>}, {pipeline_mode = #tpu.pipeline_mode<synchronous>, transform_indices = @transform_3, window_bounds = array<i64: 128, 128>}, {pipeline_mode = #tpu.pipeline_mode<synchronous>, transform_indices = @transform_4, window_bounds = array<i64: 1, 128>}, {pipeline_mode = #tpu.pipeline_mode<synchronous>, transform_indices = @transform_5, window_bounds = array<i64: 128, 128>}, {pipeline_mode = #tpu.pipeline_mode<synchronous>, transform_indices = @transform_6, window_bounds = array<i64: 1, 128>}, {pipeline_mode = #tpu.pipeline_mode<synchronous>, transform_indices = @transform_7, window_bounds = array<i64: 128, 128>}, {pipeline_mode = #tpu.pipeline_mode<synchronous>, transform_indices = @transform_8, window_bounds = array<i64: 1, 128>}, {transform_indices = @transform_9, window_bounds = array<i64: 32, 128>}]} {
    %c0 = arith.constant 0 : index
    %c0_0 = arith.constant 0 : index
    %0 = vector.load %arg1[%c0, %c0_0] : memref<32x16xf32, #tpu.memory_space<vmem>>, vector<32x16xf32>
    %1 = arith.truncf %0 : vector<32x16xf32> to vector<32x16xbf16>
    %c0_1 = arith.constant 0 : index
    %c0_2 = arith.constant 0 : index
    %2 = vector.load %arg2[%c0_1, %c0_2] : memref<16x128xbf16, #tpu.memory_space<vmem>>, vector<16x128xbf16>
    %cst = arith.constant dense<0.000000e+00> : vector<32x128xf32>
    %3 = tpu.matmul %1, %2, %cst {dimension_numbers = #tpu.dot_dimension_numbers<[1], [0], [0], [1], [0, 0, 1, 1], [], []>} : vector<32x16xbf16>, vector<16x128xbf16>, vector<32x128xf32> -> vector<32x128xf32>
    %c0_3 = arith.constant 0 : index
    %c0_4 = arith.constant 0 : index
    %4 = vector.load %arg3[%c0_3, %c0_4] : memref<1x128xf32, #tpu.memory_space<vmem>>, vector<1x128xf32>
    %5 = vector.broadcast %4 : vector<1x128xf32> to vector<32x128xf32>
    %6 = arith.addf %3, %5 : vector<32x128xf32>
    %cst_5 = arith.constant 0.000000e+00 : f32
    %7 = vector.broadcast %cst_5 : f32 to vector<32x128xf32>
    %8 = arith.maximumf %6, %7 : vector<32x128xf32>
    %9 = arith.truncf %8 : vector<32x128xf32> to vector<32x128xbf16>
    %c0_6 = arith.constant 0 : index
    %c0_7 = arith.constant 0 : index
    %10 = vector.load %arg4[%c0_6, %c0_7] : memref<128x128xbf16, #tpu.memory_space<vmem>>, vector<128x128xbf16>
    %cst_8 = arith.constant dense<0.000000e+00> : vector<32x128xf32>
    %11 = tpu.matmul %9, %10, %cst_8 {dimension_numbers = #tpu.dot_dimension_numbers<[1], [0], [0], [1], [0, 0, 1, 1], [], []>} : vector<32x128xbf16>, vector<128x128xbf16>, vector<32x128xf32> -> vector<32x128xf32>
    %c0_9 = arith.constant 0 : index
    %c0_10 = arith.constant 0 : index
    %12 = vector.load %arg5[%c0_9, %c0_10] : memref<1x128xf32, #tpu.memory_space<vmem>>, vector<1x128xf32>
    %13 = vector.broadcast %12 : vector<1x128xf32> to vector<32x128xf32>
    %14 = arith.addf %11, %13 : vector<32x128xf32>
    %cst_11 = arith.constant 0.000000e+00 : f32
    %15 = vector.broadcast %cst_11 : f32 to vector<32x128xf32>
    %16 = arith.maximumf %14, %15 : vector<32x128xf32>
    %17 = arith.truncf %16 : vector<32x128xf32> to vector<32x128xbf16>
    %c0_12 = arith.constant 0 : index
    %c0_13 = arith.constant 0 : index
    %18 = vector.load %arg6[%c0_12, %c0_13] : memref<128x128xbf16, #tpu.memory_space<vmem>>, vector<128x128xbf16>
    %cst_14 = arith.constant dense<0.000000e+00> : vector<32x128xf32>
    %19 = tpu.matmul %17, %18, %cst_14 {dimension_numbers = #tpu.dot_dimension_numbers<[1], [0], [0], [1], [0, 0, 1, 1], [], []>} : vector<32x128xbf16>, vector<128x128xbf16>, vector<32x128xf32> -> vector<32x128xf32>
    %c0_15 = arith.constant 0 : index
    %c0_16 = arith.constant 0 : index
    %20 = vector.load %arg7[%c0_15, %c0_16] : memref<1x128xf32, #tpu.memory_space<vmem>>, vector<1x128xf32>
    %21 = vector.broadcast %20 : vector<1x128xf32> to vector<32x128xf32>
    %22 = arith.addf %19, %21 : vector<32x128xf32>
    %cst_17 = arith.constant 0.000000e+00 : f32
    %23 = vector.broadcast %cst_17 : f32 to vector<32x128xf32>
    %24 = arith.maximumf %22, %23 : vector<32x128xf32>
    %25 = arith.truncf %24 : vector<32x128xf32> to vector<32x128xbf16>
    %c0_18 = arith.constant 0 : index
    %c0_19 = arith.constant 0 : index
    %26 = vector.load %arg8[%c0_18, %c0_19] : memref<128x128xbf16, #tpu.memory_space<vmem>>, vector<128x128xbf16>
    %cst_20 = arith.constant dense<0.000000e+00> : vector<32x128xf32>
    %27 = tpu.matmul %25, %26, %cst_20 {dimension_numbers = #tpu.dot_dimension_numbers<[1], [0], [0], [1], [0, 0, 1, 1], [], []>} : vector<32x128xbf16>, vector<128x128xbf16>, vector<32x128xf32> -> vector<32x128xf32>
    %c0_21 = arith.constant 0 : index
    %c0_22 = arith.constant 0 : index
    %28 = vector.load %arg9[%c0_21, %c0_22] : memref<1x128xf32, #tpu.memory_space<vmem>>, vector<1x128xf32>
    %29 = vector.broadcast %28 : vector<1x128xf32> to vector<32x128xf32>
    %30 = arith.addf %27, %29 : vector<32x128xf32>
    %31 = arith.truncf %30 : vector<32x128xf32> to vector<32x128xbf16>
    %c0_23 = arith.constant 0 : index
    %c0_24 = arith.constant 0 : index
    %32 = vector.load %arg10[%c0_23, %c0_24] : memref<32x128xbf16, #tpu.memory_space<vmem>>, vector<32x128xbf16>
    tpu.vector_store %arg10[%c0_23, %c0_24], %31 {strides = array<i32>} : memref<32x128xbf16, #tpu.memory_space<vmem>>, vector<32x128xbf16>,
    return
  }
  func.func @transform_0(%arg0: i32) -> (i32, i32) {
    %c0_i32 = arith.constant 0 : i32
    %c0_i32_0 = arith.constant 0 : i32
    return %arg0, %c0_i32 : i32, i32
  }
  func.func @transform_1(%arg0: i32) -> (i32, i32) {
    %c0_i32 = arith.constant 0 : i32
    %c0_i32_0 = arith.constant 0 : i32
    %c0_i32_1 = arith.constant 0 : i32
    return %c0_i32, %c0_i32_0 : i32, i32
  }
  func.func @transform_2(%arg0: i32) -> (i32, i32) {
    %c0_i32 = arith.constant 0 : i32
    %c0_i32_0 = arith.constant 0 : i32
    %c0_i32_1 = arith.constant 0 : i32
    return %c0_i32, %c0_i32_0 : i32, i32
  }
  func.func @transform_3(%arg0: i32) -> (i32, i32) {
    %c0_i32 = arith.constant 0 : i32
    %c0_i32_0 = arith.constant 0 : i32
    %c0_i32_1 = arith.constant 0 : i32
    return %c0_i32, %c0_i32_0 : i32, i32
  }
  func.func @transform_4(%arg0: i32) -> (i32, i32) {
    %c0_i32 = arith.constant 0 : i32
    %c0_i32_0 = arith.constant 0 : i32
    %c0_i32_1 = arith.constant 0 : i32
    return %c0_i32, %c0_i32_0 : i32, i32
  }
  func.func @transform_5(%arg0: i32) -> (i32, i32) {
    %c0_i32 = arith.constant 0 : i32
    %c0_i32_0 = arith.constant 0 : i32
    %c0_i32_1 = arith.constant 0 : i32
    return %c0_i32, %c0_i32_0 : i32, i32
  }
  func.func @transform_6(%arg0: i32) -> (i32, i32) {
    %c0_i32 = arith.constant 0 : i32
    %c0_i32_0 = arith.constant 0 : i32
    %c0_i32_1 = arith.constant 0 : i32
    return %c0_i32, %c0_i32_0 : i32, i32
  }
  func.func @transform_7(%arg0: i32) -> (i32, i32) {
    %c0_i32 = arith.constant 0 : i32
    %c0_i32_0 = arith.constant 0 : i32
    %c0_i32_1 = arith.constant 0 : i32
    return %c0_i32, %c0_i32_0 : i32, i32
  }
  func.func @transform_8(%arg0: i32) -> (i32, i32) {
    %c0_i32 = arith.constant 0 : i32
    %c0_i32_0 = arith.constant 0 : i32
    %c0_i32_1 = arith.constant 0 : i32
    return %c0_i32, %c0_i32_0 : i32, i32
  }
  func.func @transform_9(%arg0: i32) -> (i32, i32) {
    %c0_i32 = arith.constant 0 : i32
    %c0_i32_0 = arith.constant 0 : i32
    return %arg0, %c0_i32 : i32, i32
  }
}

</mosaic_0001>

<bundles_post_ra>
// kernel: dqn_forward.1
= control target key start
LH: loop header
LB: loop body
LE: loop exit
PB: predicated region body
PF: predicated region fallthrough
CT: control target
= control target key end

     0   :  { %14 = vsyncpa [#allocation3], 0  ;;  %s1128_s0 = inlined_call_operand.hbm [shape: f32[2,16], index: 0, kind: input, shape index: {}]   ;;  %s1129_s1 = inlined_call_operand.vmem [shape: bf16[16,128], index: 1, kind: input, shape index: {}]   ;;  %s1130_s2 = inlined_call_operand.vmem [shape: f32[1,128], index: 2, kind: input, shape index: {}]   ;;  %s1131_s3 = inlined_call_operand.hbm [shape: bf16[128,128], index: 3, kind: input, shape index: {}]   ;;  %s1132_s4 = inlined_call_operand.vmem [shape: f32[1,128], index: 4, kind: input, shape index: {}]   ;;  %s1133_s5 = inlined_call_operand.hbm [shape: bf16[128,128], index: 5, kind: input, shape index: {}]   ;;  %s1134_s6 = inlined_call_operand.vmem [shape: f32[1,128], index: 6, kind: input, shape index: {}]   ;;  %s1135_s7 = inlined_call_operand.hbm [shape: bf16[128,128], index: 7, kind: input, shape index: {}]   ;;  %s1136_s8 = inlined_call_operand.vmem [shape: f32[1,128], index: 8, kind: input, shape index: {}]   ;;  %s1137_s9 = inlined_call_operand.vmem [shape: bf16[2,128], index: 9, kind: output, shape index: {}]  }
   0x1   :  { %15 = vsyncpa [#allocation5], 0 }
   0x2   :  { %16 = vsyncpa [#allocation8], 0 }
   0x3   :  { %21 = vsyncadd [#allocation3], 480  ;;  %s987_s30 = smov [#allocation4]   ;;  %s893_s13 = scalar_lea.hbm %s1131_s3, 1024 }
   0x4   :  { %s38_s10 = sshll.u32 %s987_s30, 4  ;;  %p894_p0 = scmp.ne.s32.totalorder %s1131_s3, %s893_s13  ;;  %s39_s10 = int_to_ptr.vmem [resolvable:$true] %s38_s10 }
   0x5   :  { %p897_p1 = scmp.lt.u32.totalorder %s893_s13, %s1131_s3 }
   0x7   :  { %p899_p2 = pnand %p897_p1, %p894_p0 }
   0x9   :  { %902 = shalt.err (!%p899_p2)
}
   0xa   :  { %s903_s18 = scalar_lea.vmem %s39_s10, 1024  ;;  %p908_p4 = scmp.lt.s32.totalorder %s39_s10, %s39_s10 }
   0xb   :  { %p904_p3 = scmp.ne.s32.totalorder %s39_s10, %s903_s18  ;;  %p909_p5 = scmp.lt.s32.totalorder %s903_s18, %s903_s18 }
   0xd   :  { %p910_p6 = por %p909_p5, %p908_p4 }
   0xf   :  { %p911_p7 = pnand %p910_p6, %p904_p3 }
  0x11   :  { %914 = shalt.err (!%p911_p7)
}
  0x12   :  { %s988_s19 = smov 64   ;;  %s989_s20 = smov 4  }
  0x13   :  { %44 = dma.hbm_to_vmem [thread:$0]  %s1131_s3, 1024, %s39_s10, [#allocation5], %s988_s19, %s988_s19, %s989_s20  }
  0x14   :  { %s990_s23 = smov [#allocation2]   ;;  %s915_s27 = scalar_lea.hbm %s1128_s0, 32 }
  0x15   :  { %s22_s24 = sshll.u32 %s990_s23, 4  ;;  %p916_p8 = scmp.ne.s32.totalorder %s1128_s0, %s915_s27  ;;  %s23_s24 = int_to_ptr.vmem [resolvable:$true] %s22_s24 }
  0x16   :  { %p919_p9 = scmp.lt.u32.totalorder %s915_s27, %s1128_s0 }
  0x18   :  { %p921_p10 = pnand %p919_p9, %p916_p8 }
  0x1a   :  { %924 = shalt.err (!%p921_p10)
}
  0x1b   :  { %s925_s12 = scalar_lea.vmem %s23_s24, 32  ;;  %s929_s3 = scalar_lea.vmem %s23_s24, 512 }
  0x1c   :  { %p926_p11 = scmp.ne.s32.totalorder %s23_s24, %s925_s12  ;;  %p930_p12 = scmp.lt.s32.totalorder %s23_s24, %s23_s24 }
  0x1d   :  { %p931_p13 = scmp.lt.s32.totalorder %s929_s3, %s925_s12 }
  0x1f   :  { %p932_p0 = por %p931_p13, %p930_p12 }
  0x21   :  { %p933_p1 = pnand %p932_p0, %p926_p11 }
  0x23   :  { %936 = shalt.err (!%p933_p1)
}
  0x24   :  { %s991_s10 = smov 32   ;;  %s992_s13 = smov 2  }
  0x25   :  { %28 = dma.hbm_to_vmem [thread:$0]  %s1128_s0, 32, %s23_s24, [#allocation3], %s991_s10, %s991_s10, %s992_s13  }
  0x26   :  { %s993_s16 = smov [#allocation6]   ;;  %s994_s18 = smov [#allocation7]  }
  0x27   :  { %s52_s17 = sshll.u32 %s993_s16, 4  ;;  %s66_s21 = sshll.u32 %s994_s18, 4  ;;  %s53_s17 = int_to_ptr.vmem [resolvable:$true] %s52_s17  ;;  %s1073_s21 = int_to_ptr.vmem [resolvable:$true] %s66_s21 }
  0x28   :  { %s937_s25 = scalar_lea.hbm %s1133_s5, 1024 }
  0x29   :  { %p938_p2 = scmp.ne.s32.totalorder %s1133_s5, %s937_s25  ;;  %p941_p3 = scmp.lt.u32.totalorder %s937_s25, %s1133_s5 }
  0x2b   :  { %p943_p4 = pnand %p941_p3, %p938_p2 }
  0x2d   :  { %946 = shalt.err (!%p943_p4)
}
  0x2e   :  { %s947_s0 = scalar_lea.vmem %s53_s17, 1024  ;;  %p952_p6 = scmp.lt.s32.totalorder %s53_s17, %s53_s17 }
  0x2f   :  { %p948_p5 = scmp.ne.s32.totalorder %s53_s17, %s947_s0  ;;  %p953_p7 = scmp.lt.s32.totalorder %s947_s0, %s947_s0 }
  0x31   :  { %p954_p8 = por %p953_p7, %p952_p6 }
  0x33   :  { %p955_p9 = pnand %p954_p8, %p948_p5 }
  0x35   :  { %958 = shalt.err (!%p955_p9)
}
  0x36   :  { %58 = dma.hbm_to_vmem [thread:$0]  %s1133_s5, 1024, %s53_s17, [#allocation5], %s988_s19, %s988_s19, %s989_s20  }
  0x37   :  { %s959_s3 = scalar_lea.hbm %s1135_s7, 1024 }
  0x38   :  { %p960_p10 = scmp.ne.s32.totalorder %s1135_s7, %s959_s3  ;;  %p963_p11 = scmp.lt.u32.totalorder %s959_s3, %s1135_s7 }
  0x3a   :  { %p965_p12 = pnand %p963_p11, %p960_p10 }
  0x3c   :  { %968 = shalt.err (!%p965_p12)
}
  0x3d   :  { %s969_s16 = scalar_lea.vmem %s1073_s21, 1024  ;;  %p974_p0 = scmp.lt.s32.totalorder %s1073_s21, %s1073_s21 }
  0x3e   :  { %p970_p13 = scmp.ne.s32.totalorder %s1073_s21, %s969_s16  ;;  %p975_p1 = scmp.lt.s32.totalorder %s969_s16, %s969_s16 }
  0x40   :  { %p976_p2 = por %p975_p1, %p974_p0 }
  0x42   :  { %p977_p3 = pnand %p976_p2, %p970_p13 }
  0x44   :  { %980 = shalt.err (!%p977_p3)
}
  0x45   :  { %72 = dma.hbm_to_vmem [thread:$0]  %s1135_s7, 1024, %s1073_s21, [#allocation8], %s988_s19, %s988_s19, %s989_s20  }
  0x46   :  { %981 = dma.done.wait [#allocation3], 512  }
  0x47   :  { %982 = vsyncadd [#allocation3], 4294966784 }
  0x48   :  { %983 = dma.done.wait [#allocation5], 2048  }
  0x49   :  { %984 = vsyncadd [#allocation5], 4294965248 }
  0x4a   :  { %985 = dma.done.wait [#allocation8], 1024  }
  0x4b   :  { %986 = vsyncadd [#allocation8], 4294966272  ;;  %v868_v0 = vld [vmem:[%s1129_s1] sm:$0xff]   ;;  %v88_v1 = vld [vmem:[#allocation2] sm:$0xff]  ;;  %vm109_vm0 = vcmask 130048  }
  0x4c   :  { %v89_v2 = vld [vmem:[#allocation2 + $0x8] sm:$0xff]  ;;  %v90_v3 = vld [vmem:[#allocation2 + $0x10] sm:$0xff]  ;;  %793 = vmatprep.subr.bf16.mxu0 %v868_v0  ;;  %v91_v5 = vld [vmem:[#allocation2 + $0x18] sm:$0xff] }
  0x4d   :  { %v92_v4 = vpack.c.bf16 %v89_v2, %v88_v1  ;;  %794 = vmatpush3.bf16.msra.mxu0 %v868_v0  ;;  %v93_v6 = vpack.c.bf16 %v91_v5, %v90_v3  ;;  %v869_v7 = vld [vmem:[#allocation4] sm:$0xff]   ;;  %v870_v8 = vld [vmem:[#allocation4 + $0x8] sm:$0xff]   ;;  %v871_v9 = vld [vmem:[#allocation4 + $0x10] sm:$0xff]  }
  0x4e   :  { %799 = vmatprep.subr.bf16.mxu1 %v869_v7  ;;  %v872_v10 = vld [vmem:[#allocation4 + $0x18] sm:$0xff]   ;;  %v873_v11 = vld [vmem:[#allocation4 + $0x20] sm:$0xff]   ;;  %v874_v12 = vld [vmem:[#allocation4 + $0x28] sm:$0xff]  }
  0x4f   :  { %795 = vmatprep.mubr.msk.bf16.mxu0 %vm109_vm0, %v92_v4  ;;  %800 = vmatpush3.bf16.msra.mxu1 %v869_v7  ;;  %v875_v13 = vld [vmem:[#allocation4 + $0x30] sm:$0xff]   ;;  %v876_v14 = vld [vmem:[#allocation4 + $0x38] sm:$0xff]   ;;  %v877_v15 = vld [vmem:[#allocation6] sm:$0xff]  }
  0x50   :  { %796 = vmatmul.mubr.msk.bf16.vlgmr.msra.gmra.mrb[0].mxu0 %vm109_vm0, %v93_v6  ;;  %801 = vmatprep.subr.bf16.mxu1 %v870_v8  ;;  %v878_v16 = vld [vmem:[#allocation6 + $0x8] sm:$0xff]   ;;  %v879_v17 = vld [vmem:[#allocation6 + $0x10] sm:$0xff]   ;;  %v880_v18 = vld [vmem:[#allocation6 + $0x18] sm:$0xff]  }
  0x51   :  { %819 = vmatprep.subr.bf16.mxu0 %v877_v15  ;;  %v881_v19 = vld [vmem:[#allocation6 + $0x20] sm:$0xff]   ;;  %v882_v20 = vld [vmem:[#allocation6 + $0x28] sm:$0xff]   ;;  %v719_v21 = vld [vmem:[%s1130_s2] ss:$0 sm:$0xff] }
  0x52   :  { %820 = vmatpush3.bf16.msra.mxu0 %v877_v15  ;;  %v883_v36 = vld [vmem:[#allocation6 + $0x30] sm:$0xff]   ;;  %v884_v37 = vld [vmem:[#allocation6 + $0x38] sm:$0xff]   ;;  %v885_v38 = vld [vmem:[#allocation7] sm:$0xff]  }
  0x53   :  { %802 = vmatpush3.bf16.msra.mxu1 %v870_v8  ;;  %821 = vmatprep.subr.bf16.mxu0 %v878_v16  ;;  %v886_v39 = vld [vmem:[#allocation7 + $0x8] sm:$0xff]   ;;  %v887_v40 = vld [vmem:[#allocation7 + $0x10] sm:$0xff]   ;;  %v888_v41 = vld [vmem:[#allocation7 + $0x18] sm:$0xff]  }
  0x54   :  { %803 = vmatprep.subr.bf16.mxu1 %v871_v9  ;;  %v889_v42 = vld [vmem:[#allocation7 + $0x20] sm:$0xff]   ;;  %v890_v43 = vld [vmem:[#allocation7 + $0x28] sm:$0xff]   ;;  %v723_v44 = vld [vmem:[%s1132_s4] ss:$0 sm:$0xff] }
  0x55   :  { %v891_v59 = vld [vmem:[#allocation7 + $0x30] sm:$0xff]   ;;  %v892_v60 = vld [vmem:[#allocation7 + $0x38] sm:$0xff]  }
  0x56   :  { %822 = vmatpush3.bf16.msra.mxu0 %v878_v16  ;;  %v732_v61 = vld [vmem:[%s1134_s6] ss:$0 sm:$0xff] }
  0x57   :  { %804 = vmatpush3.bf16.msra.mxu1 %v871_v9  ;;  %823 = vmatprep.subr.bf16.mxu0 %v879_v17 }
  0x58   :  { %805 = vmatprep.subr.bf16.mxu1 %v872_v10 }
  0x5a   :  { %824 = vmatpush3.bf16.msra.mxu0 %v879_v17 }
  0x5b   :  { %806 = vmatpush3.bf16.msra.mxu1 %v872_v10  ;;  %825 = vmatprep.subr.bf16.mxu0 %v880_v18 }
  0x5c   :  { %807 = vmatprep.subr.bf16.mxu1 %v873_v11 }
  0x5e   :  { %826 = vmatpush3.bf16.msra.mxu0 %v880_v18  ;;  %v741_v18 = vld [vmem:[%s1136_s8] ss:$0 sm:$0xff] }
  0x5f   :  { %808 = vmatpush3.bf16.msra.mxu1 %v873_v11  ;;  %827 = vmatprep.subr.bf16.mxu0 %v881_v19 }
  0x60   :  { %809 = vmatprep.subr.bf16.mxu1 %v874_v12 }
  0x62   :  { %828 = vmatpush3.bf16.msra.mxu0 %v881_v19 }
  0x63   :  { %810 = vmatpush3.bf16.msra.mxu1 %v874_v12  ;;  %829 = vmatprep.subr.bf16.mxu0 %v882_v20  ;;  %v995_v12 = vmov 1966171168  }
  0x64   :  { %811 = vmatprep.subr.bf16.mxu1 %v875_v13 }
  0x66   :  { %830 = vmatpush3.bf16.msra.mxu0 %v882_v20 }
  0x67   :  { %812 = vmatpush3.bf16.msra.mxu1 %v875_v13  ;;  %831 = vmatprep.subr.bf16.mxu0 %v883_v36  ;;  %v549_v13 = vunpack.c.l.s4 %v995_v12 }
  0x68   :  { %813 = vmatprep.subr.bf16.mxu1 %v876_v14 }
  0x69   :  { %v550_v15 = vunpack.c.0.s8 %v549_v13 }
  0x6a   :  { %832 = vmatpush3.bf16.msra.mxu0 %v883_v36 }
  0x6b   :  { %814 = vmatpush3.bf16.msra.mxu1 %v876_v14  ;;  %833 = vmatprep.subr.bf16.mxu0 %v884_v37  ;;  %v551_v14 = vlaneseq }
  0x6c   :  { %839 = vmatprep.subr.bf16.mxu1 %v885_v38 }
  0x6d   :  { %v552_v16 = vshrl.u32 %v551_v14, 7 }
  0x6e   :  { %834 = vmatpush3.bf16.msra.mxu0 %v884_v37 }
 0x123   :  { %v797_v22 = vpop.f32.mrb[0].mxu0 }
 0x124   :  { %v159_v23 = vadd.f32 %v797_v22, %v719_v21  ;;  %v150_v24 = vpop.f32.mrb[1].mxu0 }
 0x125   :  { %v151_v25 = vadd.f32 %v719_v21, %v150_v24  ;;  %v798_v26 = vpop.f32.mrb[2].mxu0 }
 0x126   :  { %v162_v27 = vadd.f32 %v798_v26, %v719_v21  ;;  %v153_v28 = vpop.f32.mrb[3].mxu0  ;;  %v167_v30 = vmax.f32 %v159_v23, 0.0 }
 0x127   :  { %v154_v29 = vadd.f32 %v719_v21, %v153_v28  ;;  %v165_v32 = vmax.f32 %v151_v25, 0.0  ;;  %v553_v21 = vsub.s32 %v550_v15, %v552_v16 }
 0x128   :  { %v168_v31 = vmax.f32 %v162_v27, 0.0 }
 0x129   :  { %v166_v33 = vmax.f32 %v154_v29, 0.0 }
 0x12a   :  { %v170_v34 = vpack.c.bf16 %v168_v31, %v167_v30 }
 0x12b   :  { %v169_v35 = vpack.c.bf16 %v166_v33, %v165_v32 }
 0x12d   :  { %815 = vmatprep.mubr.bf16.mxu1 %v169_v35 }
 0x12e   :  { %816 = vmatmul.mubr.bf16.vlgmr.msra.gmra.mrb[0].mxu1 %v170_v34 }
 0x12f   :  { %840 = vmatpush3.bf16.msra.mxu1 %v885_v38 }
 0x130   :  { %841 = vmatprep.subr.bf16.mxu1 %v886_v39 }
 0x133   :  { %842 = vmatpush3.bf16.msra.mxu1 %v886_v39 }
 0x134   :  { %843 = vmatprep.subr.bf16.mxu1 %v887_v40 }
 0x137   :  { %844 = vmatpush3.bf16.msra.mxu1 %v887_v40 }
 0x138   :  { %845 = vmatprep.subr.bf16.mxu1 %v888_v41 }
 0x13b   :  { %846 = vmatpush3.bf16.msra.mxu1 %v888_v41 }
 0x13c   :  { %847 = vmatprep.subr.bf16.mxu1 %v889_v42 }
 0x13f   :  { %848 = vmatpush3.bf16.msra.mxu1 %v889_v42 }
 0x140   :  { %849 = vmatprep.subr.bf16.mxu1 %v890_v43 }
 0x143   :  { %850 = vmatpush3.bf16.msra.mxu1 %v890_v43 }
 0x144   :  { %851 = vmatprep.subr.bf16.mxu1 %v891_v59 }
 0x147   :  { %852 = vmatpush3.bf16.msra.mxu1 %v891_v59 }
 0x148   :  { %853 = vmatprep.subr.bf16.mxu1 %v892_v60 }
 0x14b   :  { %854 = vmatpush3.bf16.msra.mxu1 %v892_v60 }
 0x201   :  { %v817_v45 = vpop.f32.mrb[0].mxu1 }
 0x202   :  { %v285_v46 = vadd.f32 %v817_v45, %v723_v44  ;;  %v276_v47 = vpop.f32.mrb[1].mxu1 }
 0x203   :  { %v277_v48 = vadd.f32 %v723_v44, %v276_v47  ;;  %v818_v49 = vpop.f32.mrb[2].mxu1 }
 0x204   :  { %v288_v50 = vadd.f32 %v818_v49, %v723_v44  ;;  %v279_v51 = vpop.f32.mrb[3].mxu1  ;;  %v293_v53 = vmax.f32 %v285_v46, 0.0 }
 0x205   :  { %v280_v52 = vadd.f32 %v723_v44, %v279_v51  ;;  %v291_v55 = vmax.f32 %v277_v48, 0.0 }
 0x206   :  { %v294_v54 = vmax.f32 %v288_v50, 0.0 }
 0x207   :  { %v292_v56 = vmax.f32 %v280_v52, 0.0 }
 0x208   :  { %v296_v57 = vpack.c.bf16 %v294_v54, %v293_v53 }
 0x209   :  { %v295_v58 = vpack.c.bf16 %v292_v56, %v291_v55 }
 0x20b   :  { %835 = vmatprep.mubr.bf16.mxu0 %v295_v58 }
 0x20c   :  { %836 = vmatmul.mubr.bf16.vlgmr.msra.gmra.mrb[4].mxu0 %v296_v57 }
 0x2df   :  { %v837_v62 = vpop.f32.mrb[4].mxu0 }
 0x2e0   :  { %v411_v63 = vadd.f32 %v837_v62, %v732_v61  ;;  %v402_v0 = vpop.f32.mrb[5].mxu0 }
 0x2e1   :  { %v403_v1 = vadd.f32 %v732_v61, %v402_v0  ;;  %v838_v2 = vpop.f32.mrb[6].mxu0 }
 0x2e2   :  { %v414_v3 = vadd.f32 %v838_v2, %v732_v61  ;;  %v405_v4 = vpop.f32.mrb[7].mxu0  ;;  %v419_v6 = vmax.f32 %v411_v63, 0.0 }
 0x2e3   :  { %v406_v5 = vadd.f32 %v732_v61, %v405_v4  ;;  %v417_v8 = vmax.f32 %v403_v1, 0.0 }
 0x2e4   :  { %v420_v7 = vmax.f32 %v414_v3, 0.0 }
 0x2e5   :  { %v418_v9 = vmax.f32 %v406_v5, 0.0 }
 0x2e6   :  { %v422_v10 = vpack.c.bf16 %v420_v7, %v419_v6 }
 0x2e7   :  { %v421_v11 = vpack.c.bf16 %v418_v9, %v417_v8 }
 0x2e9   :  { %855 = vmatprep.mubr.bf16.mxu1 %v421_v11 }
 0x2ea   :  { %856 = vmatmul.mubr.bf16.vlgmr.msra.gmra.mrb[4].mxu1 %v422_v10 }
 0x3bd   :  { %v857_v17 = vpop.f32.mrb[4].mxu1 }
 0x3be   :  { %v528_v19 = vpop.f32.mrb[5].mxu1 }
 0x3bf   :  { %v858_v20 = vpop.f32.mrb[6].mxu1  ;;  %v529_v23 = vadd.f32 %v741_v18, %v528_v19 }
 0x3c0   :  { %v531_v22 = vpop.f32.mrb[7].mxu1 }
 0x3c1   :  { %v532_v24 = vadd.f32 %v741_v18, %v531_v22 }
 0x3c3   :  { %v543_v25 = vpack.c.bf16 %v532_v24, %v529_v23 }
 0x3c5   :  { %v554_v26 = vrot.slane %v543_v25, %v553_v21 }
 0x3c7   :  { %752 = vst.sshfl [vmem:[#allocation9] sm:$0x1 pattern:$0x73625140] %v554_v26 }
 0x3ce   :  { %v694_v27 = vld [vmem:[#allocation9] sm:$0x1] }
 0x3cf   :  { %695 = vst [vmem:[%s1137_s9] sm:$0x1] %v694_v27 }
 0x3d0   :  { %712 = vsyncpa [#allocation3], 1 }
 0x3d1   :  { %713 = vsyncpa [#allocation5], 1 }
 0x3d2   :  { %714 = vsyncpa [#allocation8], 1 }

// kernel: dqn_forward.1
= control target key start
LH: loop header
LB: loop body
LE: loop exit
PB: predicated region body
PF: predicated region fallthrough
CT: control target
= control target key end

     0   :  { %14 = vsyncpa [#allocation3], 0  ;;  %s1128_s0 = inlined_call_operand.hbm [shape: f32[2,16], index: 0, kind: input, shape index: {}]   ;;  %s1129_s1 = inlined_call_operand.vmem [shape: bf16[16,128], index: 1, kind: input, shape index: {}]   ;;  %s1130_s2 = inlined_call_operand.vmem [shape: f32[1,128], index: 2, kind: input, shape index: {}]   ;;  %s1131_s3 = inlined_call_operand.hbm [shape: bf16[128,128], index: 3, kind: input, shape index: {}]   ;;  %s1132_s4 = inlined_call_operand.vmem [shape: f32[1,128], index: 4, kind: input, shape index: {}]   ;;  %s1133_s5 = inlined_call_operand.hbm [shape: bf16[128,128], index: 5, kind: input, shape index: {}]   ;;  %s1134_s6 = inlined_call_operand.vmem [shape: f32[1,128], index: 6, kind: input, shape index: {}]   ;;  %s1135_s7 = inlined_call_operand.hbm [shape: bf16[128,128], index: 7, kind: input, shape index: {}]   ;;  %s1136_s8 = inlined_call_operand.vmem [shape: f32[1,128], index: 8, kind: input, shape index: {}]   ;;  %s1137_s9 = inlined_call_operand.vmem [shape: bf16[2,128], index: 9, kind: output, shape index: {}]  }
   0x1   :  { %15 = vsyncpa [#allocation5], 0 }
   0x2   :  { %16 = vsyncpa [#allocation8], 0 }
   0x3   :  { %21 = vsyncadd [#allocation3], 480  ;;  %s987_s30 = smov [#allocation4]   ;;  %s893_s13 = scalar_lea.hbm %s1131_s3, 1024 }
   0x4   :  { %s38_s10 = sshll.u32 %s987_s30, 4  ;;  %p894_p0 = scmp.ne.s32.totalorder %s1131_s3, %s893_s13  ;;  %s39_s10 = int_to_ptr.vmem [resolvable:$true] %s38_s10 }
   0x5   :  { %p897_p1 = scmp.lt.u32.totalorder %s893_s13, %s1131_s3 }
   0x7   :  { %p899_p2 = pnand %p897_p1, %p894_p0 }
   0x9   :  { %902 = shalt.err (!%p899_p2)
}
   0xa   :  { %s903_s18 = scalar_lea.vmem %s39_s10, 1024  ;;  %p908_p4 = scmp.lt.s32.totalorder %s39_s10, %s39_s10 }
   0xb   :  { %p904_p3 = scmp.ne.s32.totalorder %s39_s10, %s903_s18  ;;  %p909_p5 = scmp.lt.s32.totalorder %s903_s18, %s903_s18 }
   0xd   :  { %p910_p6 = por %p909_p5, %p908_p4 }
   0xf   :  { %p911_p7 = pnand %p910_p6, %p904_p3 }
  0x11   :  { %914 = shalt.err (!%p911_p7)
}
  0x12   :  { %s988_s19 = smov 64   ;;  %s989_s20 = smov 4  }
  0x13   :  { %44 = dma.hbm_to_vmem [thread:$0]  %s1131_s3, 1024, %s39_s10, [#allocation5], %s988_s19, %s988_s19, %s989_s20  }
  0x14   :  { %s990_s23 = smov [#allocation2]   ;;  %s915_s27 = scalar_lea.hbm %s1128_s0, 32 }
  0x15   :  { %s22_s24 = sshll.u32 %s990_s23, 4  ;;  %p916_p8 = scmp.ne.s32.totalorder %s1128_s0, %s915_s27  ;;  %s23_s24 = int_to_ptr.vmem [resolvable:$true] %s22_s24 }
  0x16   :  { %p919_p9 = scmp.lt.u32.totalorder %s915_s27, %s1128_s0 }
  0x18   :  { %p921_p10 = pnand %p919_p9, %p916_p8 }
  0x1a   :  { %924 = shalt.err (!%p921_p10)
}
  0x1b   :  { %s925_s12 = scalar_lea.vmem %s23_s24, 32  ;;  %s929_s3 = scalar_lea.vmem %s23_s24, 512 }
  0x1c   :  { %p926_p11 = scmp.ne.s32.totalorder %s23_s24, %s925_s12  ;;  %p930_p12 = scmp.lt.s32.totalorder %s23_s24, %s23_s24 }
  0x1d   :  { %p931_p13 = scmp.lt.s32.totalorder %s929_s3, %s925_s12 }
  0x1f   :  { %p932_p0 = por %p931_p13, %p930_p12 }
  0x21   :  { %p933_p1 = pnand %p932_p0, %p926_p11 }
  0x23   :  { %936 = shalt.err (!%p933_p1)
}
  0x24   :  { %s991_s10 = smov 32   ;;  %s992_s13 = smov 2  }
  0x25   :  { %28 = dma.hbm_to_vmem [thread:$0]  %s1128_s0, 32, %s23_s24, [#allocation3], %s991_s10, %s991_s10, %s992_s13  }
  0x26   :  { %s993_s16 = smov [#allocation6]   ;;  %s994_s18 = smov [#allocation7]  }
  0x27   :  { %s52_s17 = sshll.u32 %s993_s16, 4  ;;  %s66_s21 = sshll.u32 %s994_s18, 4  ;;  %s53_s17 = int_to_ptr.vmem [resolvable:$true] %s52_s17  ;;  %s1073_s21 = int_to_ptr.vmem [resolvable:$true] %s66_s21 }
  0x28   :  { %s937_s25 = scalar_lea.hbm %s1133_s5, 1024 }
  0x29   :  { %p938_p2 = scmp.ne.s32.totalorder %s1133_s5, %s937_s25  ;;  %p941_p3 = scmp.lt.u32.totalorder %s937_s25, %s1133_s5 }
  0x2b   :  { %p943_p4 = pnand %p941_p3, %p938_p2 }
  0x2d   :  { %946 = shalt.err (!%p943_p4)
}
  0x2e   :  { %s947_s0 = scalar_lea.vmem %s53_s17, 1024  ;;  %p952_p6 = scmp.lt.s32.totalorder %s53_s17, %s53_s17 }
  0x2f   :  { %p948_p5 = scmp.ne.s32.totalorder %s53_s17, %s947_s0  ;;  %p953_p7 = scmp.lt.s32.totalorder %s947_s0, %s947_s0 }
  0x31   :  { %p954_p8 = por %p953_p7, %p952_p6 }
  0x33   :  { %p955_p9 = pnand %p954_p8, %p948_p5 }
  0x35   :  { %958 = shalt.err (!%p955_p9)
}
  0x36   :  { %58 = dma.hbm_to_vmem [thread:$0]  %s1133_s5, 1024, %s53_s17, [#allocation5], %s988_s19, %s988_s19, %s989_s20  }
  0x37   :  { %s959_s3 = scalar_lea.hbm %s1135_s7, 1024 }
  0x38   :  { %p960_p10 = scmp.ne.s32.totalorder %s1135_s7, %s959_s3  ;;  %p963_p11 = scmp.lt.u32.totalorder %s959_s3, %s1135_s7 }
  0x3a   :  { %p965_p12 = pnand %p963_p11, %p960_p10 }
  0x3c   :  { %968 = shalt.err (!%p965_p12)
}
  0x3d   :  { %s969_s16 = scalar_lea.vmem %s1073_s21, 1024  ;;  %p974_p0 = scmp.lt.s32.totalorder %s1073_s21, %s1073_s21 }
  0x3e   :  { %p970_p13 = scmp.ne.s32.totalorder %s1073_s21, %s969_s16  ;;  %p975_p1 = scmp.lt.s32.totalorder %s969_s16, %s969_s16 }
  0x40   :  { %p976_p2 = por %p975_p1, %p974_p0 }
  0x42   :  { %p977_p3 = pnand %p976_p2, %p970_p13 }
  0x44   :  { %980 = shalt.err (!%p977_p3)
}
  0x45   :  { %72 = dma.hbm_to_vmem [thread:$0]  %s1135_s7, 1024, %s1073_s21, [#allocation8], %s988_s19, %s988_s19, %s989_s20  }
  0x46   :  { %981 = dma.done.wait [#allocation3], 512  }
  0x47   :  { %982 = vsyncadd [#allocation3], 4294966784 }
  0x48   :  { %983 = dma.done.wait [#allocation5], 2048  }
  0x49   :  { %984 = vsyncadd [#allocation5], 4294965248 }
  0x4a   :  { %985 = dma.done.wait [#allocation8], 1024  }
  0x4b   :  { %986 = vsyncadd [#allocation8], 4294966272  ;;  %v868_v0 = vld [vmem:[%s1129_s1] sm:$0xff]   ;;  %v88_v1 = vld [vmem:[#allocation2] sm:$0xff]  ;;  %vm109_vm0 = vcmask 130048  }
  0x4c   :  { %v89_v2 = vld [vmem:[#allocation2 + $0x8] sm:$0xff]  ;;  %v90_v3 = vld [vmem:[#allocation2 + $0x10] sm:$0xff]  ;;  %793 = vmatprep.subr.bf16.mxu0 %v868_v0  ;;  %v91_v5 = vld [vmem:[#allocation2 + $0x18] sm:$0xff] }
  0x4d   :  { %v92_v4 = vpack.c.bf16 %v89_v2, %v88_v1  ;;  %794 = vmatpush3.bf16.msra.mxu0 %v868_v0  ;;  %v93_v6 = vpack.c.bf16 %v91_v5, %v90_v3  ;;  %v869_v7 = vld [vmem:[#allocation4] sm:$0xff]   ;;  %v870_v8 = vld [vmem:[#allocation4 + $0x8] sm:$0xff]   ;;  %v871_v9 = vld [vmem:[#allocation4 + $0x10] sm:$0xff]  }
  0x4e   :  { %799 = vmatprep.subr.bf16.mxu1 %v869_v7  ;;  %v872_v10 = vld [vmem:[#allocation4 + $0x18] sm:$0xff]   ;;  %v873_v11 = vld [vmem:[#allocation4 + $0x20] sm:$0xff]   ;;  %v874_v12 = vld [vmem:[#allocation4 + $0x28] sm:$0xff]  }
  0x4f   :  { %795 = vmatprep.mubr.msk.bf16.mxu0 %vm109_vm0, %v92_v4  ;;  %800 = vmatpush3.bf16.msra.mxu1 %v869_v7  ;;  %v875_v13 = vld [vmem:[#allocation4 + $0x30] sm:$0xff]   ;;  %v876_v14 = vld [vmem:[#allocation4 + $0x38] sm:$0xff]   ;;  %v877_v15 = vld [vmem:[#allocation6] sm:$0xff]  }
  0x50   :  { %796 = vmatmul.mubr.msk.bf16.vlgmr.msra.gmra.mrb[0].mxu0 %vm109_vm0, %v93_v6  ;;  %801 = vmatprep.subr.bf16.mxu1 %v870_v8  ;;  %v878_v16 = vld [vmem:[#allocation6 + $0x8] sm:$0xff]   ;;  %v879_v17 = vld [vmem:[#allocation6 + $0x10] sm:$0xff]   ;;  %v880_v18 = vld [vmem:[#allocation6 + $0x18] sm:$0xff]  }
  0x51   :  { %819 = vmatprep.subr.bf16.mxu0 %v877_v15  ;;  %v881_v19 = vld [vmem:[#allocation6 + $0x20] sm:$0xff]   ;;  %v882_v20 = vld [vmem:[#allocation6 + $0x28] sm:$0xff]   ;;  %v719_v21 = vld [vmem:[%s1130_s2] ss:$0 sm:$0xff] }
  0x52   :  { %820 = vmatpush3.bf16.msra.mxu0 %v877_v15  ;;  %v883_v36 = vld [vmem:[#allocation6 + $0x30] sm:$0xff]   ;;  %v884_v37 = vld [vmem:[#allocation6 + $0x38] sm:$0xff]   ;;  %v885_v38 = vld [vmem:[#allocation7] sm:$0xff]  }
  0x53   :  { %802 = vmatpush3.bf16.msra.mxu1 %v870_v8  ;;  %821 = vmatprep.subr.bf16.mxu0 %v878_v16  ;;  %v886_v39 = vld [vmem:[#allocation7 + $0x8] sm:$0xff]   ;;  %v887_v40 = vld [vmem:[#allocation7 + $0x10] sm:$0xff]   ;;  %v888_v41 = vld [vmem:[#allocation7 + $0x18] sm:$0xff]  }
  0x54   :  { %803 = vmatprep.subr.bf16.mxu1 %v871_v9  ;;  %v889_v42 = vld [vmem:[#allocation7 + $0x20] sm:$0xff]   ;;  %v890_v43 = vld [vmem:[#allocation7 + $0x28] sm:$0xff]   ;;  %v723_v44 = vld [vmem:[%s1132_s4] ss:$0 sm:$0xff] }
  0x55   :  { %v891_v59 = vld [vmem:[#allocation7 + $0x30] sm:$0xff]   ;;  %v892_v60 = vld [vmem:[#allocation7 + $0x38] sm:$0xff]  }
  0x56   :  { %822 = vmatpush3.bf16.msra.mxu0 %v878_v16  ;;  %v732_v61 = vld [vmem:[%s1134_s6] ss:$0 sm:$0xff] }
  0x57   :  { %804 = vmatpush3.bf16.msra.mxu1 %v871_v9  ;;  %823 = vmatprep.subr.bf16.mxu0 %v879_v17 }
  0x58   :  { %805 = vmatprep.subr.bf16.mxu1 %v872_v10 }
  0x5a   :  { %824 = vmatpush3.bf16.msra.mxu0 %v879_v17 }
  0x5b   :  { %806 = vmatpush3.bf16.msra.mxu1 %v872_v10  ;;  %825 = vmatprep.subr.bf16.mxu0 %v880_v18 }
  0x5c   :  { %807 = vmatprep.subr.bf16.mxu1 %v873_v11 }
  0x5e   :  { %826 = vmatpush3.bf16.msra.mxu0 %v880_v18  ;;  %v741_v18 = vld [vmem:[%s1136_s8] ss:$0 sm:$0xff] }
  0x5f   :  { %808 = vmatpush3.bf16.msra.mxu1 %v873_v11  ;;  %827 = vmatprep.subr.bf16.mxu0 %v881_v19 }
  0x60   :  { %809 = vmatprep.subr.bf16.mxu1 %v874_v12 }
  0x62   :  { %828 = vmatpush3.bf16.msra.mxu0 %v881_v19 }
  0x63   :  { %810 = vmatpush3.bf16.msra.mxu1 %v874_v12  ;;  %829 = vmatprep.subr.bf16.mxu0 %v882_v20  ;;  %v995_v12 = vmov 1966171168  }
  0x64   :  { %811 = vmatprep.subr.bf16.mxu1 %v875_v13 }
  0x66   :  { %830 = vmatpush3.bf16.msra.mxu0 %v882_v20 }
  0x67   :  { %812 = vmatpush3.bf16.msra.mxu1 %v875_v13  ;;  %831 = vmatprep.subr.bf16.mxu0 %v883_v36  ;;  %v549_v13 = vunpack.c.l.s4 %v995_v12 }
  0x68   :  { %813 = vmatprep.subr.bf16.mxu1 %v876_v14 }
  0x69   :  { %v550_v15 = vunpack.c.0.s8 %v549_v13 }
  0x6a   :  { %832 = vmatpush3.bf16.msra.mxu0 %v883_v36 }
  0x6b   :  { %814 = vmatpush3.bf16.msra.mxu1 %v876_v14  ;;  %833 = vmatprep.subr.bf16.mxu0 %v884_v37  ;;  %v551_v14 = vlaneseq }
  0x6c   :  { %839 = vmatprep.subr.bf16.mxu1 %v885_v38 }
  0x6d   :  { %v552_v16 = vshrl.u32 %v551_v14, 7 }
  0x6e   :  { %834 = vmatpush3.bf16.msra.mxu0 %v884_v37 }
 0x123   :  { %v797_v22 = vpop.f32.mrb[0].mxu0 }
 0x124   :  { %v159_v23 = vadd.f32 %v797_v22, %v719_v21  ;;  %v150_v24 = vpop.f32.mrb[1].mxu0 }
 0x125   :  { %v151_v25 = vadd.f32 %v719_v21, %v150_v24  ;;  %v798_v26 = vpop.f32.mrb[2].mxu0 }
 0x126   :  { %v162_v27 = vadd.f32 %v798_v26, %v719_v21  ;;  %v153_v28 = vpop.f32.mrb[3].mxu0  ;;  %v167_v30 = vmax.f32 %v159_v23, 0.0 }
 0x127   :  { %v154_v29 = vadd.f32 %v719_v21, %v153_v28  ;;  %v165_v32 = vmax.f32 %v151_v25, 0.0  ;;  %v553_v21 = vsub.s32 %v550_v15, %v552_v16 }
 0x128   :  { %v168_v31 = vmax.f32 %v162_v27, 0.0 }
 0x129   :  { %v166_v33 = vmax.f32 %v154_v29, 0.0 }
 0x12a   :  { %v170_v34 = vpack.c.bf16 %v168_v31, %v167_v30 }
 0x12b   :  { %v169_v35 = vpack.c.bf16 %v166_v33, %v165_v32 }
 0x12d   :  { %815 = vmatprep.mubr.bf16.mxu1 %v169_v35 }
 0x12e   :  { %816 = vmatmul.mubr.bf16.vlgmr.msra.gmra.mrb[0].mxu1 %v170_v34 }
 0x12f   :  { %840 = vmatpush3.bf16.msra.mxu1 %v885_v38 }
 0x130   :  { %841 = vmatprep.subr.bf16.mxu1 %v886_v39 }
 0x133   :  { %842 = vmatpush3.bf16.msra.mxu1 %v886_v39 }
 0x134   :  { %843 = vmatprep.subr.bf16.mxu1 %v887_v40 }
 0x137   :  { %844 = vmatpush3.bf16.msra.mxu1 %v887_v40 }
 0x138   :  { %845 = vmatprep.subr.bf16.mxu1 %v888_v41 }
 0x13b   :  { %846 = vmatpush3.bf16.msra.mxu1 %v888_v41 }
 0x13c   :  { %847 = vmatprep.subr.bf16.mxu1 %v889_v42 }
 0x13f   :  { %848 = vmatpush3.bf16.msra.mxu1 %v889_v42 }
 0x140   :  { %849 = vmatprep.subr.bf16.mxu1 %v890_v43 }
 0x143   :  { %850 = vmatpush3.bf16.msra.mxu1 %v890_v43 }
 0x144   :  { %851 = vmatprep.subr.bf16.mxu1 %v891_v59 }
 0x147   :  { %852 = vmatpush3.bf16.msra.mxu1 %v891_v59 }
 0x148   :  { %853 = vmatprep.subr.bf16.mxu1 %v892_v60 }
 0x14b   :  { %854 = vmatpush3.bf16.msra.mxu1 %v892_v60 }
 0x201   :  { %v817_v45 = vpop.f32.mrb[0].mxu1 }
 0x202   :  { %v285_v46 = vadd.f32 %v817_v45, %v723_v44  ;;  %v276_v47 = vpop.f32.mrb[1].mxu1 }
 0x203   :  { %v277_v48 = vadd.f32 %v723_v44, %v276_v47  ;;  %v818_v49 = vpop.f32.mrb[2].mxu1 }
 0x204   :  { %v288_v50 = vadd.f32 %v818_v49, %v723_v44  ;;  %v279_v51 = vpop.f32.mrb[3].mxu1  ;;  %v293_v53 = vmax.f32 %v285_v46, 0.0 }
 0x205   :  { %v280_v52 = vadd.f32 %v723_v44, %v279_v51  ;;  %v291_v55 = vmax.f32 %v277_v48, 0.0 }
 0x206   :  { %v294_v54 = vmax.f32 %v288_v50, 0.0 }
 0x207   :  { %v292_v56 = vmax.f32 %v280_v52, 0.0 }
 0x208   :  { %v296_v57 = vpack.c.bf16 %v294_v54, %v293_v53 }
 0x209   :  { %v295_v58 = vpack.c.bf16 %v292_v56, %v291_v55 }
 0x20b   :  { %835 = vmatprep.mubr.bf16.mxu0 %v295_v58 }
 0x20c   :  { %836 = vmatmul.mubr.bf16.vlgmr.msra.gmra.mrb[4].mxu0 %v296_v57 }
 0x2df   :  { %v837_v62 = vpop.f32.mrb[4].mxu0 }
 0x2e0   :  { %v411_v63 = vadd.f32 %v837_v62, %v732_v61  ;;  %v402_v0 = vpop.f32.mrb[5].mxu0 }
 0x2e1   :  { %v403_v1 = vadd.f32 %v732_v61, %v402_v0  ;;  %v838_v2 = vpop.f32.mrb[6].mxu0 }
 0x2e2   :  { %v414_v3 = vadd.f32 %v838_v2, %v732_v61  ;;  %v405_v4 = vpop.f32.mrb[7].mxu0  ;;  %v419_v6 = vmax.f32 %v411_v63, 0.0 }
 0x2e3   :  { %v406_v5 = vadd.f32 %v732_v61, %v405_v4  ;;  %v417_v8 = vmax.f32 %v403_v1, 0.0 }
 0x2e4   :  { %v420_v7 = vmax.f32 %v414_v3, 0.0 }
 0x2e5   :  { %v418_v9 = vmax.f32 %v406_v5, 0.0 }
 0x2e6   :  { %v422_v10 = vpack.c.bf16 %v420_v7, %v419_v6 }
 0x2e7   :  { %v421_v11 = vpack.c.bf16 %v418_v9, %v417_v8 }
 0x2e9   :  { %855 = vmatprep.mubr.bf16.mxu1 %v421_v11 }
 0x2ea   :  { %856 = vmatmul.mubr.bf16.vlgmr.msra.gmra.mrb[4].mxu1 %v422_v10 }
 0x3bd   :  { %v857_v17 = vpop.f32.mrb[4].mxu1 }
 0x3be   :  { %v528_v19 = vpop.f32.mrb[5].mxu1 }
 0x3bf   :  { %v858_v20 = vpop.f32.mrb[6].mxu1  ;;  %v529_v23 = vadd.f32 %v741_v18, %v528_v19 }
 0x3c0   :  { %v531_v22 = vpop.f32.mrb[7].mxu1 }
 0x3c1   :  { %v532_v24 = vadd.f32 %v741_v18, %v531_v22 }
 0x3c3   :  { %v543_v25 = vpack.c.bf16 %v532_v24, %v529_v23 }
 0x3c5   :  { %v554_v26 = vrot.slane %v543_v25, %v553_v21 }
 0x3c7   :  { %752 = vst.sshfl [vmem:[#allocation9] sm:$0x1 pattern:$0x73625140] %v554_v26 }
 0x3ce   :  { %v694_v27 = vld [vmem:[#allocation9] sm:$0x1] }
 0x3cf   :  { %695 = vst [vmem:[%s1137_s9] sm:$0x1] %v694_v27 }
 0x3d0   :  { %712 = vsyncpa [#allocation3], 1 }
 0x3d1   :  { %713 = vsyncpa [#allocation5], 1 }
 0x3d2   :  { %714 = vsyncpa [#allocation8], 1 }

</bundles_post_ra>
